<compile_context>
chip_gen: v6e
topology: v6e:2x2x1
jax: 0.10.0
libtpu: 0.0.40
codegen_flags: <defaults>
</compile_context>

<pallas_src>
import functools

import jax
import jax.numpy as jnp
from jax.experimental import pallas as pl
from jax.experimental.pallas import tpu as pltpu

_MATMUL_DTYPE = jnp.bfloat16   # matmul operand dtype (accumulation stays f32)
_LANE = 128                    # TPU lane width: pad K up to this for dense stores
_SUBLANE = 8                   # sublane alignment for row tiles


def _embed_kernel(patches_ref, w_ref, b_ref, o_ref, acc_ref, *, inv_hw):
    """One (batch b, row-tile t) grid step.

    patches_ref : (TM, 9*C)   bf16 im2col rows for batch b, tile t
    w_ref       : (9*C, KP)   bf16 conv weight as a matmul (K zero-padded to KP)
    b_ref       : (1, KP)     f32 conv bias (zero-padded)
    o_ref       : (1, KP)     f32 pooled embedding for batch b
    acc_ref     : (1, KP)     f32 running spatial sum (VMEM scratch)
    """
    t = pl.program_id(1)

    @pl.when(t == 0)
    def _():
        acc_ref[...] = jnp.zeros_like(acc_ref)

    # Conv-as-matmul on the MXU, f32 accumulation.
    y = jnp.dot(patches_ref[...], w_ref[...], preferred_element_type=jnp.float32)
    y = jnp.maximum(y + b_ref[...], 0.0)                   # bias + ReLU (f32, VPU)
    acc_ref[...] += jnp.sum(y, axis=0, keepdims=True)      # partial spatial sum (XLU)

    @pl.when(t == pl.num_programs(1) - 1)
    def _():
        o_ref[...] = acc_ref[...] * inv_hw                 # global average pool


def _im2col_3x3_same(x_nhwc):
    """x_nhwc: [B,H,W,C] -> patches [B, H*W, 9*C] (kh, kw, C ordering)."""
    B, H, W, C = x_nhwc.shape
    xp = jnp.pad(x_nhwc, ((0, 0), (1, 1), (1, 1), (0, 0)))
    cols = [xp[:, i:i + H, j:j + W, :] for i in range(3) for j in range(3)]
    patches = jnp.stack(cols, axis=3)                      # [B, H, W, 9, C]
    return patches.reshape(B, H * W, 9 * C)


def _pick_row_tile(n_rows, ck, vmem_budget_bytes=4 << 20):
    """Largest sublane-aligned row tile that divides n_rows and whose
    double-buffered bf16 patch tile fits comfortably in VMEM."""
    bytes_per_row = 2 * ck * 2                             # bf16, x2 double buffer
    max_rows = max(_SUBLANE, vmem_budget_bytes // max(bytes_per_row, 1))
    if n_rows <= max_rows:
        return n_rows                                      # full extent is always legal
    max_rows -= max_rows % _SUBLANE
    for tm in range(max_rows, _SUBLANE - 1, -_SUBLANE):
        if n_rows % tm == 0:
            return tm
    return n_rows


@jax.jit
def embed_forward(x_nchw, conv_w, conv_b):
    """Forward pass of Embed.

    x_nchw : [B, C, H, W]  (PyTorch NCHW convention)
    conv_w : [K, C, 3, 3]  (PyTorch Conv2d weight layout)
    conv_b : [K]
    returns: [B, K] pooled features (Flatten after 1x1 global avg pool)
    """
    B, C, H, W = x_nchw.shape
    K = conv_w.shape[0]
    HW = H * W
    CK = 9 * C
    KP = ((K + _LANE - 1) // _LANE) * _LANE                # K padded to lane width
    TM = _pick_row_tile(HW, CK)
    n_tiles = HW // TM

    # TODO(synk): for very large H*W the remaining 9x im2col HBM blowup could be
    # removed by building the 9 conv taps in-kernel from a halo'd NHWC tile; kept
    # in the wrapper here for robustness at these (tiny-channel) shapes.
    x_nhwc = jnp.transpose(x_nchw, (0, 2, 3, 1))           # NCHW -> NHWC
    patches = _im2col_3x3_same(x_nhwc).astype(_MATMUL_DTYPE)   # [B, HW, 9*C]

    # [K, C, kh, kw] -> [kh, kw, C, K] -> [9*C, K] -> zero-pad to [9*C, KP]
    w_mat = jnp.transpose(conv_w, (2, 3, 1, 0)).reshape(CK, K)
    w_mat = jnp.pad(w_mat, ((0, 0), (0, KP - K))).astype(_MATMUL_DTYPE)
    b_mat = jnp.pad(conv_b, (0, KP - K)).reshape(1, KP).astype(jnp.float32)

    kernel = functools.partial(_embed_kernel, inv_hw=1.0 / HW)

    # Advisory cost hint so XLA schedules surrounding ops around this call.
    flops = 2 * B * HW * CK * KP + 3 * B * HW * KP
    bytes_accessed = (B * HW * CK * 2        # patches (bf16)
                      + CK * KP * 2          # weights (bf16)
                      + KP * 4               # bias (f32)
                      + B * KP * 4)          # output (f32)

    out = pl.pallas_call(
        kernel,
        out_shape=jax.ShapeDtypeStruct((B, 1, KP), jnp.float32),
        grid=(B, n_tiles),
        in_specs=[
            pl.BlockSpec((None, TM, CK), lambda b, t: (b, t, 0)),
            pl.BlockSpec((CK, KP), lambda b, t: (0, 0)),
            pl.BlockSpec((1, KP), lambda b, t: (0, 0)),
        ],
        out_specs=pl.BlockSpec((None, 1, KP), lambda b, t: (b, 0, 0)),
        scratch_shapes=[pltpu.VMEM((1, KP), jnp.float32)],
        compiler_params=pltpu.CompilerParams(
            # batch axis shards across TensorCores (v7x megacore);
            # spatial-row axis is the accumulated reduction.
            dimension_semantics=("parallel", "arbitrary")),
        cost_estimate=pl.CostEstimate(
            flops=flops, transcendentals=0, bytes_accessed=bytes_accessed),
    )(patches, w_mat, b_mat)

    return out.reshape(B, KP)[:, :K]


def _reference(x_nchw, conv_w, conv_b):
    """Pure-JAX reference: Conv2d(pad=1) -> ReLU -> global avg pool -> flatten."""
    y = jax.lax.conv_general_dilated(
        x_nchw, conv_w, window_strides=(1, 1), padding=((1, 1), (1, 1)),
        dimension_numbers=("NCHW", "OIHW", "NCHW"))
    y = y + conv_b.reshape(1, -1, 1, 1)
    y = jnp.maximum(y, 0.0)
    return y.mean(axis=(2, 3))  # [B, K]


if __name__ == "__main__":
    B, C, H, W, K = 2, 4, 16, 16, 32

    key = jax.random.PRNGKey(0)
    kx, kw, kb = jax.random.split(key, 3)
    x = jax.random.normal(kx, (B, C, H, W), dtype=jnp.float32)
    # Deterministic synthetic parameters (no checkpoint loading).
    conv_w = 0.1 * jax.random.normal(kw, (K, C, 3, 3), dtype=jnp.float32)
    conv_b = 0.1 * jax.random.normal(kb, (K,), dtype=jnp.float32)

    out = embed_forward(x, conv_w, conv_b)
    jax.block_until_ready(out)

    ref = _reference(x, conv_w, conv_b)
    assert out.shape == (B, K), out.shape
    # bf16 matmul operands with f32 accumulation -> slightly loosened tolerance.
    max_err = float(jnp.max(jnp.abs(out - ref)))
    assert jnp.allclose(out, ref, atol=2e-2, rtol=2e-2), (
        f"mismatch vs reference, max abs err = {max_err}")

    print("KERNEL_OK")
</pallas_src>

<mosaic_0001>
module attributes {stable_mosaic.version = 11 : i64} {
  func.func @_embed_kernel(%arg0: i32, %arg1: i32, %arg2: memref<1x256x36xbf16, #tpu.memory_space<vmem>>, %arg3: memref<36x128xbf16, #tpu.memory_space<vmem>>, %arg4: memref<1x128xf32, #tpu.memory_space<vmem>>, %arg5: memref<1x1x128xf32, #tpu.memory_space<vmem>>, %arg6: memref<1x128xf32, #tpu.memory_space<vmem>>) attributes {dimension_semantics = [#tpu.dimension_semantics<parallel>, #tpu.dimension_semantics<arbitrary>], iteration_bounds = array<i64: 2, 1>, scalar_prefetch = 0 : i64, scratch_operands = 1 : i64, tpu.core_type = #tpu.core_type<tc>, window_params = [{transform_indices = @transform_0, window_bounds = array<i64: 1, 256, 36>}, {pipeline_mode = #tpu.pipeline_mode<synchronous>, transform_indices = @transform_1, window_bounds = array<i64: 36, 128>}, {pipeline_mode = #tpu.pipeline_mode<synchronous>, transform_indices = @transform_2, window_bounds = array<i64: 1, 128>}, {transform_indices = @transform_3, window_bounds = array<i64: 1, 1, 128>}]} {
    %c0_i32 = arith.constant 0 : i32
    %0 = arith.cmpi eq, %arg1, %c0_i32 : i32
    %1 = arith.extui %0 : i1 to i32
    %c0_i32_0 = arith.constant 0 : i32
    %2 = arith.cmpi ne, %1, %c0_i32_0 : i32
    scf.if %2 {
      %cst_15 = arith.constant 0.000000e+00 : f32
      %20 = vector.broadcast %cst_15 : f32 to vector<1x128xf32>
      %c0_16 = arith.constant 0 : index
      %c0_17 = arith.constant 0 : index
      %21 = vector.load %arg6[%c0_16, %c0_17] : memref<1x128xf32, #tpu.memory_space<vmem>>, vector<1x128xf32>
      tpu.vector_store %arg6[%c0_16, %c0_17], %20 {strides = array<i32>} : memref<1x128xf32, #tpu.memory_space<vmem>>, vector<1x128xf32>,
    } else {
    }
    %c0 = arith.constant 0 : index
    %c0_1 = arith.constant 0 : index
    %c0_2 = arith.constant 0 : index
    %3 = vector.load %arg2[%c0, %c0_1, %c0_2] : memref<1x256x36xbf16, #tpu.memory_space<vmem>>, vector<1x256x36xbf16>
    %4 = vector.shape_cast %3 : vector<1x256x36xbf16> to vector<256x36xbf16>
    %c0_3 = arith.constant 0 : index
    %c0_4 = arith.constant 0 : index
    %5 = vector.load %arg3[%c0_3, %c0_4] : memref<36x128xbf16, #tpu.memory_space<vmem>>, vector<36x128xbf16>
    %cst = arith.constant dense<0.000000e+00> : vector<256x128xf32>
    %6 = tpu.matmul %4, %5, %cst {dimension_numbers = #tpu.dot_dimension_numbers<[1], [0], [0], [1], [0, 0, 1, 1], [], []>} : vector<256x36xbf16>, vector<36x128xbf16>, vector<256x128xf32> -> vector<256x128xf32>
    %c0_5 = arith.constant 0 : index
    %c0_6 = arith.constant 0 : index
    %7 = vector.load %arg4[%c0_5, %c0_6] : memref<1x128xf32, #tpu.memory_space<vmem>>, vector<1x128xf32>
    %8 = vector.broadcast %7 : vector<1x128xf32> to vector<256x128xf32>
    %9 = arith.addf %6, %8 : vector<256x128xf32>
    %cst_7 = arith.constant 0.000000e+00 : f32
    %10 = vector.broadcast %cst_7 : f32 to vector<256x128xf32>
    %11 = arith.maximumf %9, %10 : vector<256x128xf32>
    %c0_8 = arith.constant 0 : index
    %c0_9 = arith.constant 0 : index
    %12 = vector.load %arg6[%c0_8, %c0_9] : memref<1x128xf32, #tpu.memory_space<vmem>>, vector<1x128xf32>
    %cst_10 = arith.constant dense<0.000000e+00> : vector<128xf32>
    %13 = vector.multi_reduction <add>, %11, %cst_10 [0] : vector<256x128xf32> to vector<128xf32>
    %14 = vector.shape_cast %13 : vector<128xf32> to vector<1x128xf32>
    %15 = arith.addf %12, %14 : vector<1x128xf32>
    %c0_11 = arith.constant 0 : index
    %c0_12 = arith.constant 0 : index
    %16 = vector.load %arg6[%c0_11, %c0_12] : memref<1x128xf32, #tpu.memory_space<vmem>>, vector<1x128xf32>
    tpu.vector_store %arg6[%c0_11, %c0_12], %15 {strides = array<i32>} : memref<1x128xf32, #tpu.memory_space<vmem>>, vector<1x128xf32>,
    %c0_i32_13 = arith.constant 0 : i32
    %17 = arith.cmpi eq, %arg1, %c0_i32_13 : i32
    %18 = arith.extui %17 : i1 to i32
    %c0_i32_14 = arith.constant 0 : i32
    %19 = arith.cmpi ne, %18, %c0_i32_14 : i32
    scf.if %19 {
      %c0_15 = arith.constant 0 : index
      %c0_16 = arith.constant 0 : index
      %20 = vector.load %arg6[%c0_15, %c0_16] : memref<1x128xf32, #tpu.memory_space<vmem>>, vector<1x128xf32>
      %cst_17 = arith.constant 3.906250e-03 : f32
      %21 = vector.broadcast %cst_17 : f32 to vector<1x128xf32>
      %22 = arith.mulf %20, %21 : vector<1x128xf32>
      %c0_18 = arith.constant 0 : index
      %c0_19 = arith.constant 0 : index
      %c0_20 = arith.constant 0 : index
      %23 = vector.load %arg5[%c0_18, %c0_19, %c0_20] : memref<1x1x128xf32, #tpu.memory_space<vmem>>, vector<1x1x128xf32>
      %24 = vector.shape_cast %23 : vector<1x1x128xf32> to vector<1x128xf32>
      %25 = vector.shape_cast %22 : vector<1x128xf32> to vector<1x1x128xf32>
      tpu.vector_store %arg5[%c0_18, %c0_19, %c0_20], %25 {strides = array<i32>} : memref<1x1x128xf32, #tpu.memory_space<vmem>>, vector<1x1x128xf32>,
    } else {
    }
    return
  }
  func.func @transform_0(%arg0: i32, %arg1: i32) -> (i32, i32, i32) {
    %c0_i32 = arith.constant 0 : i32
    %c0_i32_0 = arith.constant 0 : i32
    return %arg0, %arg1, %c0_i32 : i32, i32, i32
  }
  func.func @transform_1(%arg0: i32, %arg1: i32) -> (i32, i32) {
    %c0_i32 = arith.constant 0 : i32
    %c0_i32_0 = arith.constant 0 : i32
    %c0_i32_1 = arith.constant 0 : i32
    return %c0_i32, %c0_i32_0 : i32, i32
  }
  func.func @transform_2(%arg0: i32, %arg1: i32) -> (i32, i32) {
    %c0_i32 = arith.constant 0 : i32
    %c0_i32_0 = arith.constant 0 : i32
    %c0_i32_1 = arith.constant 0 : i32
    return %c0_i32, %c0_i32_0 : i32, i32
  }
  func.func @transform_3(%arg0: i32, %arg1: i32) -> (i32, i32, i32) {
    %c0_i32 = arith.constant 0 : i32
    %c0_i32_0 = arith.constant 0 : i32
    %c0_i32_1 = arith.constant 0 : i32
    return %arg0, %c0_i32, %c0_i32_0 : i32, i32, i32
  }
}

</mosaic_0001>

<bundles_post_ra>
// kernel: embed_forward.1
= control target key start
LH: loop header
LB: loop body
LE: loop exit
PB: predicated region body
PF: predicated region fallthrough
CT: control target
= control target key end

     0   :  { %8 = vsyncpa [#allocation4], 0  ;;  %s1193_s0 = inlined_call_operand.vmem [shape: bf16[2,256,36], index: 0, kind: input, shape index: {}]   ;;  %s1194_s1 = inlined_call_operand.vmem [shape: bf16[36,128], index: 1, kind: input, shape index: {}]   ;;  %s1195_s2 = inlined_call_operand.vmem [shape: f32[1,128], index: 2, kind: input, shape index: {}]   ;;  %s1196_s3 = inlined_call_operand.hbm [shape: f32[2,1,128], index: 3, kind: output, shape index: {}]  }
   0x1   :  { %10 = vsyncpa [#allocation4 + $0x1], 0  ;;  %s1002_s12 = smov 0   ;;  %s1004_s13 = smov 0  }
   0x2   :  { %s1006_s14 = smov 0   ;;  %s1008_s15 = smov 0  }
   0x3   :  { %s1010_s16 = smov 0   ;;  %s1012_s17 = smov 0  }
   0x4 LB: > { %s715_s18 = sadd.s32 4294967295, %s978_s17   ;;  %s716_s19 = sadd.s32 4294967294, %s978_s17   ;;  %s978_s17 = sphi %s1012_s17, %s16_s17   ;;  %s974_s16 = sphi %s1010_s16, %s1203_s16   ;;  %s970_s15 = sphi %s1008_s15, %s1202_s15   ;;  %s966_s14 = sphi %s1006_s14, %s1201_s14   ;;  %s962_s13 = sphi %s1004_s13, %s1200_s13   ;;  %s958_s12 = sphi %s1002_s12, %s1199_s12  }
   0x5   : > { %s28_s20 = sadd.s32 1, %s974_s16  ;;  %s105_s21 = sadd.s32 1, %s966_s14 }
   0x6   : > { %p30_p0 = scmp.ge.s32.totalorder %s28_s20, 2  ;;  %p115_p1 = scmp.ne.s32.totalorder %s966_s14, %s962_s13 }
   0x7   : > { %p116_p2 = scmp.eq.s32.totalorder %s715_s18, 1  ;;  %p121_p3 = scmp.ne.s32.totalorder %s962_s13, %s958_s12 }
   0x8   : > { %s1205_s20 = smov (%p30_p0, %s28_s20), 0  ;;  %p122_p5 = scmp.eq.s32.totalorder %s716_s19, 1 }
   0x9   : > { %p1042_p4 = por %p116_p2, %p115_p1  ;;  %s102_s23 = ssub.s32 %s974_s16, %s1205_s20 }
   0xa   : > { %p719_p6 = scmp.ge.s32.totalorder %s978_s17, 1  ;;  %p103_p7 = scmp.eq.s32.totalorder %s102_s23, 0 }
   0xb   : > { %p1049_p8 = por %p122_p5, %p121_p3  ;;  %p159_p9 = scmp.lt.s32.totalorder %s978_s17, 3 }
   0xc   : > { %s1055_s25 = scalar_select %p103_p7, %s966_s14, %s105_s21  }
   0xd   : > { %p160_p10 = pnand %p719_p6, %p159_p9 }
   0xe   : > { %p187_p11 = scmp.lt.s32.totalorder (!%p160_p10), %s970_s15, 1  ;;  %s184_s18 = sand.u32 (!%p160_p10), 1, %s962_s13  }
   0xf   : > { %163 = sbr.rel (%p160_p10) target bundleno = 335 (0x14f), region = 32  ;;  %s758_s19 = sshll.u32 (!%p160_p10), %s970_s15, 4 }
  0x10   : > { %s185_s21 = scalar_lea.vmem (!%p160_p10), [#allocation3], %s184_s18  ;;  %s644_s28 = scalar_lea.hbm (!%p160_p10), %s1196_s3, %s758_s19 }
  0x11   : > { %s646_s23 = sshll.u32 (!%p160_p10), %s185_s21, 4  ;;  %s634_s29 = scalar_lea.sflag (!%p160_p10), [#allocation4], %s184_s18  ;;  %s647_s23 = int_to_ptr.vmem [resolvable:$true] %s646_s23 }
  0x12   : > { %s981_s4 = smov (!%p160_p10), [#allocation3]  }
  0x13   : > { %s906_s5 = sshll.u32 (!%p160_p10), %s981_s4, 4  ;;  %s907_s5 = int_to_ptr.vmem [resolvable:$false] %s906_s5 }
  0x14   : > { %v883_v0 = vld [vmem:[%s1194_s1 + $0x10] ss:$0 sps:$4 sm:$0x33]   ;;  %vm390_vm0 = vcmask 1041408   ;;  %v884_v1 = vld [vmem:[%s1194_s1 + $0x8] sm:$0xff]   ;;  %s188_s30 = scalar_select %p187_p11, %s970_s15, 1 }
  0x15   : > { %825 = vmatprep.subr.msk.bf16.mxu0 %vm390_vm0, %v883_v0  ;;  %v392_v2 = vsel %vm390_vm0, %v883_v0, 0  ;;  %826 = vmatprep.subr.msk.bf16.mxu1 %vm390_vm0, %v883_v0  ;;  %v885_v3 = vld [vmem:[%s1194_s1] sm:$0xff]   ;;  %vm341_vm1 = vcmask 293888   ;;  %v980_v20 = vmov 0.0   ;;  %s908_s15 = scalar_lea.vmem %s907_s5, 32  ;;  %p909_p1 = scmp.lt.s32.totalorder %s647_s23, %s907_s5 }
  0x16   : > { %782 = vmatpush3.bf16.msra.mxu0 %v392_v2  ;;  %822 = vmatpush3.bf16.msra.mxu1 %v392_v2  ;;  %s761_s6 = sshll.u32 %s188_s30, 7  ;;  %201 = vst [vmem:[#allocation2] sm:$0x1] %v980_v20  ;;  %v1108_v23 = vld [vmem:[%s1195_s2] ss:$0 sm:$0xff]  ;;  %s902_s30 = scalar_lea.vmem %s647_s23, 16 }
  0x17   : > { %783 = vmatprep.subr.bf16.mxu0 %v884_v1  ;;  %820 = vmatprep.subr.bf16.mxu1 %v884_v1  ;;  %s1071_s9 = scalar_lea.vmem %s1193_s0, %s761_s6  ;;  %p903_p12 = scmp.ne.s32.totalorder %s647_s23, %s902_s30 }
  0x18   : > { %v886_v4 = vld [vmem:[%s1071_s9] sm:$0xff]   ;;  %v887_v5 = vld [vmem:[%s1071_s9 + $0x8] sm:$0xff]   ;;  %v888_v6 = vld [vmem:[%s1071_s9 + $0x10] sm:$0xff]   ;;  %p910_p2 = scmp.lt.s32.totalorder %s908_s15, %s902_s30 }
  0x19   : > { %787 = vmatprep.mubr.msk.bf16.mxu0 %vm341_vm1, %v886_v4  ;;  %v894_v7 = vld [vmem:[%s1071_s9 + $0x40] sm:$0xff]   ;;  %v895_v8 = vld [vmem:[%s1071_s9 + $0x48] sm:$0xff]   ;;  %v896_v9 = vld [vmem:[%s1071_s9 + $0x50] sm:$0xff]   ;;  %p904_p13 = pnand %p903_p12, %p1042_p4 }
  0x1a   : > { %784 = vmatpush3.bf16.msra.mxu0 %v884_v1  ;;  %823 = vmatpush3.bf16.msra.mxu1 %v884_v1  ;;  %v889_v10 = vld [vmem:[%s1071_s9 + $0x18] sm:$0xff]   ;;  %v890_v11 = vld [vmem:[%s1071_s9 + $0x20] sm:$0xff]   ;;  %v891_v14 = vld [vmem:[%s1071_s9 + $0x28] sm:$0xff]   ;;  %p911_p3 = por %p910_p2, %p909_p1 }
  0x1b   : > { %785 = vmatprep.subr.bf16.mxu0 %v885_v3  ;;  %821 = vmatprep.subr.bf16.mxu1 %v885_v3  ;;  %v897_v12 = vld [vmem:[%s1071_s9 + $0x58] sm:$0xff]   ;;  %v898_v13 = vld [vmem:[%s1071_s9 + $0x60] sm:$0xff]   ;;  %v892_v15 = vld [vmem:[%s1071_s9 + $0x30] sm:$0xff]   ;;  %p905_p0 = pneg %p904_p13 }
  0x1c   : > { %803 = vmatprep.mubr.msk.bf16.mxu1 %vm341_vm1, %v894_v7  ;;  %v899_v16 = vld [vmem:[%s1071_s9 + $0x68] sm:$0xff]   ;;  %v900_v17 = vld [vmem:[%s1071_s9 + $0x70] sm:$0xff]   ;;  %v893_v18 = vld [vmem:[%s1071_s9 + $0x38] sm:$0xff]  }
  0x1d   : > { %v901_v19 = vld [vmem:[%s1071_s9 + $0x78] sm:$0xff]   ;;  %p912_p5 = pnand %p911_p3, %p905_p0 }
  0x1e   : > { %786 = vmatpush3.bf16.msra.mxu0 %v885_v3  ;;  %824 = vmatpush3.bf16.msra.mxu1 %v885_v3 }
  0x21   : > { %788 = vmatmul.mubr.msk.bf16.vlgmr.msra.gmra.mxu0 %vm341_vm1, %v887_v5  ;;  %804 = vmatmul.mubr.msk.bf16.vlgmr.msra.gmra.mxu1 %vm341_vm1, %v895_v8 }
  0x22   : > { %791 = vmatprep.mubr.msk.bf16.mxu0 %vm341_vm1, %v888_v6  ;;  %807 = vmatprep.mubr.msk.bf16.mxu1 %vm341_vm1, %v896_v9 }
  0x29   : > { %792 = vmatmul.mubr.msk.bf16.gmra.mxu0 %vm341_vm1, %v889_v10  ;;  %808 = vmatmul.mubr.msk.bf16.gmra.mxu1 %vm341_vm1, %v897_v12 }
  0x2a   : > { %795 = vmatprep.mubr.msk.bf16.mxu0 %vm341_vm1, %v890_v11  ;;  %811 = vmatprep.mubr.msk.bf16.mxu1 %vm341_vm1, %v898_v13 }
  0x31   : > { %796 = vmatmul.mubr.msk.bf16.gmra.mxu0 %vm341_vm1, %v891_v14  ;;  %812 = vmatmul.mubr.msk.bf16.gmra.mxu1 %vm341_vm1, %v899_v16 }
  0x32   : > { %799 = vmatprep.mubr.msk.bf16.mxu0 %vm341_vm1, %v892_v15  ;;  %815 = vmatprep.mubr.msk.bf16.mxu1 %vm341_vm1, %v900_v17 }
  0x39   : > { %800 = vmatmul.mubr.msk.bf16.gmra.mxu0 %vm341_vm1, %v893_v18  ;;  %816 = vmatmul.mubr.msk.bf16.gmra.mxu1 %vm341_vm1, %v901_v19 }
  0xe1   : > { %v789_v21 = vpop.f32.mrf.mxu0  ;;  %v1110_v25 = vpop.f32.mrf.mxu1 }
  0xe2   : > { %v437_v29 = vadd.f32 %v789_v21, %v1108_v23 }
  0xe3   : > { %v428_v22 = vpop.f32.mrf.mxu0  ;;  %v1113_v28 = vpop.f32.mrf.mxu1 }
  0xe4   : > { %v429_v26 = vadd.f32 %v1108_v23, %v428_v22  ;;  %v557_v38 = vmax.f32 %v437_v29, 0.0 }
  0xe5   : > { %v790_v24 = vpop.f32.mrf.mxu0  ;;  %v1117_v32 = vpop.f32.mrf.mxu1 }
  0xe6   : > { %v555_v33 = vmax.f32 %v429_v26, 0.0  ;;  %v440_v34 = vadd.f32 %v790_v24, %v1108_v23 }
  0xe7   : > { %v431_v27 = vpop.f32.mrf.mxu0  ;;  %v495_v37 = vpop.f32.mrf.mxu1 }
  0xe8   : > { %v432_v30 = vadd.f32 %v1108_v23, %v431_v27  ;;  %v558_v42 = vmax.f32 %v440_v34, 0.0 }
  0xe9   : > { %v793_v31 = vpop.f32.mrf.mxu0  ;;  %v1121_v45 = vpop.f32.mrf.mxu1 }
  0xea   : > { %v556_v35 = vmax.f32 %v432_v30, 0.0  ;;  %v453_v46 = vadd.f32 %v793_v31, %v1108_v23  ;;  %v493_v30 = vadd.f32 %v1108_v23, %v1113_v28 }
  0xeb   : > { %v444_v36 = vpop.f32.mrf.mxu0  ;;  %v508_v55 = vpop.f32.mrf.mxu1 }
  0xec   : > { %v588_v39 = vadd.f32 %v556_v35, %v555_v33  ;;  %v445_v40 = vadd.f32 %v1108_v23, %v444_v36  ;;  %v561_v56 = vmax.f32 %v453_v46, 0.0  ;;  %v496_v35 = vadd.f32 %v1108_v23, %v495_v37 }
  0xed   : > { %v794_v41 = vpop.f32.mrf.mxu0  ;;  %v810_v63 = vpop.f32.mrf.mxu1  ;;  %v509_v28 = vadd.f32 %v1108_v23, %v508_v55 }
  0xee   : > { %v589_v43 = vadd.f32 %v588_v39, %v557_v38  ;;  %v559_v47 = vmax.f32 %v445_v40, 0.0  ;;  %v456_v52 = vadd.f32 %v794_v41, %v1108_v23  ;;  %v501_v38 = vadd.f32 %v1110_v25, %v1108_v23 }
  0xef   : > { %v447_v44 = vpop.f32.mrf.mxu0  ;;  %v511_v9 = vpop.f32.mrf.mxu1  ;;  %v571_v39 = vmax.f32 %v493_v30, 0.0  ;;  %v504_v41 = vadd.f32 %v1117_v32, %v1108_v23  ;;  %v517_v25 = vadd.f32 %v1121_v45, %v1108_v23  ;;  %v520_v32 = vadd.f32 %v810_v63, %v1108_v23  ;;  %v587_v30 = vld [vmem:[#allocation2] sm:$0x1] }
  0xf0   : > { %v590_v48 = vadd.f32 %v589_v43, %v558_v42  ;;  %v448_v49 = vadd.f32 %v1108_v23, %v447_v44  ;;  %v562_v60 = vmax.f32 %v456_v52, 0.0  ;;  %v572_v42 = vmax.f32 %v496_v35, 0.0 }
  0xf1   : > { %v797_v50 = vpop.f32.mrf.mxu0  ;;  %v813_v17 = vpop.f32.mrf.mxu1  ;;  %v573_v46 = vmax.f32 %v501_v38, 0.0  ;;  %v512_v37 = vadd.f32 %v1108_v23, %v511_v9  ;;  %v578_v55 = vmax.f32 %v520_v32, 0.0 }
  0xf2   : > { %v591_v51 = vadd.f32 %v590_v48, %v559_v47  ;;  %v560_v53 = vmax.f32 %v448_v49, 0.0  ;;  %v469_v0 = vadd.f32 %v797_v50, %v1108_v23  ;;  %v574_v48 = vmax.f32 %v504_v41, 0.0 }
  0xf3   : > { %v460_v54 = vpop.f32.mrf.mxu0  ;;  %v524_v27 = vpop.f32.mrf.mxu1 }
  0xf4   : > { %v592_v57 = vadd.f32 %v591_v51, %v560_v53  ;;  %v461_v58 = vadd.f32 %v1108_v23, %v460_v54  ;;  %v565_v10 = vmax.f32 %v469_v0, 0.0  ;;  %v575_v51 = vmax.f32 %v509_v28, 0.0 }
  0xf5   : > { %v798_v59 = vpop.f32.mrf.mxu0  ;;  %v814_v36 = vpop.f32.mrf.mxu1  ;;  %v576_v54 = vmax.f32 %v512_v37, 0.0  ;;  %v533_v0 = vadd.f32 %v813_v17, %v1108_v23 }
  0xf6   : > { %v593_v61 = vadd.f32 %v592_v57, %v561_v56  ;;  %v563_v1 = vmax.f32 %v461_v58, 0.0  ;;  %v472_v6 = vadd.f32 %v798_v59, %v1108_v23  ;;  %v577_v57 = vmax.f32 %v517_v25, 0.0 }
  0xf7   : > { %v463_v62 = vpop.f32.mrf.mxu0  ;;  %v527_v44 = vpop.f32.mrf.mxu1  ;;  %v525_v59 = vadd.f32 %v1108_v23, %v524_v27 }
  0xf8   : > { %v594_v2 = vadd.f32 %v593_v61, %v562_v60  ;;  %v464_v3 = vadd.f32 %v1108_v23, %v463_v62  ;;  %v566_v14 = vmax.f32 %v472_v6, 0.0  ;;  %v528_v61 = vadd.f32 %v1108_v23, %v527_v44 }
  0xf9   : > { %v801_v4 = vpop.f32.mrf.mxu0  ;;  %v817_v50 = vpop.f32.mrf.mxu1 }
  0xfa   : > { %v595_v5 = vadd.f32 %v594_v2, %v563_v1  ;;  %v564_v7 = vmax.f32 %v464_v3, 0.0  ;;  %v485_v18 = vadd.f32 %v801_v4, %v1108_v23  ;;  %v579_v1 = vmax.f32 %v525_v59, 0.0 }
  0xfb   : > { %v476_v8 = vpop.f32.mrf.mxu0  ;;  %v540_v56 = vpop.f32.mrf.mxu1  ;;  %v536_v3 = vadd.f32 %v814_v36, %v1108_v23  ;;  %v580_v4 = vmax.f32 %v528_v61, 0.0 }
  0xfc   : > { %v596_v11 = vadd.f32 %v595_v5, %v564_v7  ;;  %v477_v12 = vadd.f32 %v1108_v23, %v476_v8  ;;  %v569_v29 = vmax.f32 %v485_v18, 0.0  ;;  %v581_v5 = vmax.f32 %v533_v0, 0.0 }
  0xfd   : > { %v802_v13 = vpop.f32.mrf.mxu0  ;;  %v818_v62 = vpop.f32.mrf.mxu1  ;;  %v541_v7 = vadd.f32 %v1108_v23, %v540_v56  ;;  %v582_v8 = vmax.f32 %v536_v3, 0.0 }
  0xfe   : > { %v597_v15 = vadd.f32 %v596_v11, %v565_v10  ;;  %v567_v19 = vmax.f32 %v477_v12, 0.0  ;;  %v488_v24 = vadd.f32 %v802_v13, %v1108_v23  ;;  %v549_v11 = vadd.f32 %v817_v50, %v1108_v23 }
  0xff   : > { %v479_v16 = vpop.f32.mrf.mxu0  ;;  %v543_v63 = vpop.f32.mrf.mxu1  ;;  %v583_v12 = vmax.f32 %v541_v7, 0.0 }
 0x100   : > { %v598_v20 = vadd.f32 %v597_v15, %v566_v14  ;;  %v480_v21 = vadd.f32 %v1108_v23, %v479_v16  ;;  %v570_v33 = vmax.f32 %v488_v24, 0.0  ;;  %v544_v10 = vadd.f32 %v1108_v23, %v543_v63 }
 0x101   : > { %v552_v15 = vadd.f32 %v818_v62, %v1108_v23  ;;  %v585_v17 = vmax.f32 %v549_v11, 0.0 }
 0x102   : > { %v599_v22 = vadd.f32 %v598_v20, %v567_v19  ;;  %v568_v26 = vmax.f32 %v480_v21, 0.0  ;;  %v584_v16 = vmax.f32 %v544_v10, 0.0 }
 0x103   : > { %v586_v19 = vmax.f32 %v552_v15, 0.0 }
 0x104   : > { %v600_v31 = vadd.f32 %v599_v22, %v568_v26 }
 0x106   : > { %v601_v34 = vadd.f32 %v600_v31, %v569_v29 }
 0x108   : > { %v602_v40 = vadd.f32 %v601_v34, %v570_v33 }
 0x10a   : > { %v603_v43 = vadd.f32 %v602_v40, %v571_v39 }
 0x10c   : > { %v604_v47 = vadd.f32 %v603_v43, %v572_v42 }
 0x10e   : > { %v605_v49 = vadd.f32 %v604_v47, %v573_v46 }
 0x110   : > { %v606_v52 = vadd.f32 %v605_v49, %v574_v48 }
 0x112   : > { %v607_v53 = vadd.f32 %v606_v52, %v575_v51 }
 0x114   : > { %v608_v58 = vadd.f32 %v607_v53, %v576_v54 }
 0x116   : > { %v609_v60 = vadd.f32 %v608_v58, %v577_v57 }
 0x118   : > { %v610_v45 = vadd.f32 %v609_v60, %v578_v55 }
 0x11a   : > { %v611_v2 = vadd.f32 %v610_v45, %v579_v1 }
 0x11c   : > { %v612_v6 = vadd.f32 %v611_v2, %v580_v4 }
 0x11e   : > { %v613_v9 = vadd.f32 %v612_v6, %v581_v5 }
 0x120   : > { %v614_v13 = vadd.f32 %v613_v9, %v582_v8 }
 0x122   : > { %v615_v14 = vadd.f32 %v614_v13, %v583_v12 }
 0x124   : > { %v616_v18 = vadd.f32 %v615_v14, %v584_v16 }
 0x126   : > { %v617_v20 = vadd.f32 %v616_v18, %v585_v17 }
 0x128   : > { %v618_v21 = vadd.f32 %v617_v20, %v586_v19 }
 0x12a   : > { %v619_v22 = vrot.slane %v618_v21, 4 }
 0x12c   : > { %v620_v24 = vadd.f32 %v619_v22, %v618_v21 }
 0x12e   : > { %v621_v26 = vrot.slane %v620_v24, 2 }
 0x130   : > { %v622_v27 = vadd.f32 %v621_v26, %v620_v24 }
 0x132   : > { %v623_v29 = vrot.slane %v622_v27, 1 }
 0x134   : > { %v624_v31 = vadd.f32 %v623_v29, %v622_v27 }
 0x136   : > { %v625_v33 = vadd.f32 %v624_v31, %v587_v30 }
 0x138   : > { %626 = vst [vmem:[#allocation2] sm:$0x1] %v625_v33 }
 0x13f   : > { %v630_v23 = vld [vmem:[#allocation2] sm:$0x1] }
 0x140   : > { %v631_v34 = vmul.f32 0.00390625, %v630_v23 }
 0x142   : > { %632 = vst [vmem:[%s185_s21] sm:$0x1] %v631_v34 }
 0x143   : > { %915 = shalt.err (!%p912_p5)
}
 0x144   : > { %s916_s6 = scalar_lea.hbm %s644_s28, 16  ;;  %s920_s9 = scalar_lea.hbm %s1196_s3, 32 }
 0x145   : > { %p917_p6 = scmp.ne.s32.totalorder %s644_s28, %s916_s6  ;;  %p921_p10 = scmp.lt.s32.totalorder %s644_s28, %s1196_s3 }
 0x146   : > { %p922_p11 = scmp.lt.s32.totalorder %s920_s9, %s916_s6 }
 0x147   : > { %p918_p7 = pnand %p917_p6, %p1042_p4 }
 0x148   : > { %p923_p12 = por %p922_p11, %p921_p10 }
 0x149   : > { %p919_p9 = pneg %p918_p7 }
 0x14b   : > { %p924_p13 = pnand %p923_p12, %p919_p9 }
 0x14d   : > { %927 = shalt.err (!%p924_p13)
}
 0x14e   : > { %827 = dma.vmem_to_hbm [thread:$0]  (%p1042_p4), %s647_s23, 16, %s644_s28, %s634_s29  }
 0x14f PF: > { %p833_p0 = scmp.ge.s32.totalorder %s978_s17, 2  ;;  %s658_s18 = sand.u32 1, %s958_s12  }
 0x150   : > { %s659_s19 = scalar_lea.sflag [#allocation4], %s658_s18 }
 0x151   : > { %p830_p1 = pnand %p833_p0, %p1049_p8 }
 0x153   : > { %p831_p2 = pneg %p830_p1 }
 0x155   : > { %953 = dma.done.wait (%p831_p2), %s659_s19, 16  }
 0x156   : > { %955 = vsyncadd (%p831_p2), %s659_s19, 4294967280  ;;  %s16_s17 = sadd.s32 1, %s978_s17   ;;  %s1199_s12 = smov %s962_s13 }
 0x157   : > { %p13_p3 = scmp.ge.s32.totalorder %s16_s17, 4   ;;  %s1200_s13 = smov %s966_s14 }
 0x158   : > { %s1201_s14 = smov %s1055_s25  ;;  %s1202_s15 = smov %s974_s16 }
 0x159   : > { %s1203_s16 = smov %s1205_s20  ;;  %15 = sbr.rel (!%p13_p3) target bundleno = 4 (0x4), region = 75 }
 0x15e   :  { %663 = vsyncpa [#allocation4], 1 }
 0x15f   :  { %665 = vsyncpa [#allocation4 + $0x1], 1 }

</bundles_post_ra>
